<compile_context>
chip_gen: v5e
topology: v5e:2x2
jax: 0.10.0
libtpu: 0.0.40
codegen_flags: <defaults>
</compile_context>

<pallas_src>
import functools
import math

import jax
import jax.numpy as jnp
from jax.experimental import pallas as pl
from jax.experimental.pallas import tpu as pltpu


# ----------------------------------------------------------------------------
# Kernel
# ----------------------------------------------------------------------------
def _randcrop_kernel(keep_ref, om_ref, start_ref, x_ref, o_ref):
    """One (r_tile, l_tile) block of  out = x * where(inside_window, 1, 1-mask).

    keep_ref : (1,)          int32  SMEM (scalar prefetch) kept-window length
    om_ref   : (r_tile, 1)   f32    VMEM  per-row (1 - mask)
    start_ref: (r_tile, 1)   int32  VMEM  per-row crop-window start
    x_ref    : (r_tile, l_tile)     VMEM  input block
    o_ref    : (r_tile, l_tile)     VMEM  output block
    """
    l_tile = x_ref.shape[-1]
    l_off = pl.program_id(1) * l_tile            # scalar-unit math

    x = x_ref[...]
    keep_u = keep_ref[0].astype(jnp.uint32)

    # Window test from a single (1, l_tile) lane iota; subtracting the per-row
    # (r_tile, 1) start broadcasts to the full block.  Unsigned trick folds
    # (pos >= start) and (pos < start + keep) into one compare.
    pos = jax.lax.broadcasted_iota(jnp.int32, (1, l_tile), 1) + l_off
    offs = pltpu.bitcast(pos - start_ref[...], jnp.uint32)       # (r_tile, l_tile)
    inside = offs < keep_u

    one_minus_mask = om_ref[...].astype(x.dtype)                 # (r_tile, 1)
    scale = jnp.where(inside, jnp.asarray(1.0, x.dtype), one_minus_mask)
    o_ref[...] = x * scale


# ----------------------------------------------------------------------------
# Tiling / VMEM budgeting helpers (all static, trace-time Python)
# ----------------------------------------------------------------------------
def _round_down(a, b):
    return (a // b) * b


def _vmem_budget():
    """Per-generation byte budgets: (block_cap_bytes, vmem_limit_bytes)."""
    try:
        phys = int(pltpu.get_tpu_info().vmem_capacity_bytes)
    except Exception:
        phys = 64 << 20                      # conservative fallback (v7x per-TC)
    # v5e/v6e: 128 MiB physical -> raise scoped limit to 96 MiB.
    # v7x:      64 MiB physical -> 48 MiB scoped limit.
    vmem_limit = min(phys * 3 // 4, 96 << 20)
    # Double-buffered in + out blocks (4x block) + per-row columns + slack.
    block_cap = max(1 << 20, min(4 << 20, vmem_limit // 6))
    return block_cap, vmem_limit


def _choose_tiles(R, L, itemsize, block_cap_bytes):
    """Pick a sublane-dense, lane-dense (r_tile, l_tile) block of ~block_cap bytes."""
    SUB = max(8, 32 // itemsize)             # dense sublanes: 8 f32, 16 bf16, 32 i8
    LANE = 128

    # Lanes first: as wide as the array allows (contiguous DMA, unmasked vst),
    # capped so the minimal dense row depth still fits the byte budget.
    if L <= LANE:
        l_tile = L                           # full dim (only masked-lane case)
    else:
        l_avail = _round_down(L, LANE)       # lane-aligned; trailing block masked
        want = max(LANE, _round_down(block_cap_bytes // (SUB * itemsize), LANE))
        l_tile = min(l_avail, want)

    # Rows: fill the remaining byte budget with a dense multiple of SUB.
    if R <= SUB:
        r_tile = R                           # full dim
    else:
        want_r = max(SUB, _round_down(block_cap_bytes // (l_tile * itemsize), SUB))
        r_tile = min(_round_down(R, SUB), want_r)

    # v7x megacore: prefer >= 2 grid steps so both TensorCores get work.
    if pl.cdiv(R, r_tile) * pl.cdiv(L, l_tile) < 2:
        if l_tile >= 2 * LANE:
            l_tile = _round_down(l_tile // 2, LANE)
        elif r_tile >= 2 * SUB:
            r_tile = _round_down(r_tile // 2, SUB)
    return r_tile, l_tile


# ----------------------------------------------------------------------------
# Forward pass (jit-friendly)
# ----------------------------------------------------------------------------
def rand_crop_forward(x, label, probability_logits, magnitude, key,
                      temperature=0.1, training=True, donate_x=False):
    """Forward pass of RandCrop.

    x:                  (B, C, L) float
    label:              (B,) int32, values in {0, 1}
    probability_logits: (2,) float32  -- the nn.Parameter `self.probability`
    magnitude:          (1,) float32  -- `self.magnitude` (not learned)
    donate_x:           alias x onto the output (only a win if the caller also
                        donates x to jit; otherwise XLA inserts a copy).
    """
    B, C, L = x.shape
    R = B * C
    k_mask, k_start = jax.random.split(key)

    # ---- get_mask (glue: B scalar samples) -------------------------------
    logit_p = probability_logits[label]                                  # (B,)
    if training:
        # RelaxedBernoulli(temperature, probs=sigmoid(logit_p)).rsample()
        u = jax.random.uniform(k_mask, (B,), dtype=jnp.float32,
                               minval=1e-6, maxval=1.0 - 1e-6)
        logistic_noise = jnp.log(u) - jnp.log1p(-u)
        mask = jax.nn.sigmoid((logit_p + logistic_noise) / temperature)
    else:
        p = jax.nn.sigmoid(logit_p)
        mask = (jax.random.uniform(k_mask, (B,), dtype=jnp.float32) < p
                ).astype(jnp.float32)

    # ---- rand_crop geometry (glue: B scalar offsets, all traced) ---------
    mag = magnitude[0]
    crop = jnp.floor(mag * L).astype(jnp.int32)          # positions removed
    keep = (jnp.int32(L) - crop).reshape(1)              # kept window length
    start = jax.random.randint(k_start, (B,), 0, crop + 1, dtype=jnp.int32)

    # ---- 2-D row layout: dense sublanes, per-row scalars ------------------
    x2d = x.reshape(R, L)                                 # free reshape
    om_col = jnp.repeat(1.0 - mask, C).reshape(R, 1).astype(jnp.float32)
    start_col = jnp.repeat(start, C).reshape(R, 1).astype(jnp.int32)

    itemsize = jnp.dtype(x.dtype).itemsize
    block_cap, vmem_limit = _vmem_budget()
    r_tile, l_tile = _choose_tiles(R, L, itemsize, block_cap)
    grid = (pl.cdiv(R, r_tile), pl.cdiv(L, l_tile))       # lanes = inner axis

    col_spec_om = pl.BlockSpec((r_tile, 1), lambda r, l, keep: (r, 0))
    col_spec_start = pl.BlockSpec((r_tile, 1), lambda r, l, keep: (r, 0))
    x_spec = pl.BlockSpec((r_tile, l_tile), lambda r, l, keep: (r, l))
    o_spec = pl.BlockSpec((r_tile, l_tile), lambda r, l, keep: (r, l))

    grid_spec = pltpu.PrefetchScalarGridSpec(
        num_scalar_prefetch=1,                 # `keep` lands in SMEM
        grid=grid,
        in_specs=[col_spec_om, col_spec_start, x_spec],
        out_specs=o_spec,
    )

    # Operand order to pallas_call: (keep, om_col, start_col, x2d) -> x2d is #3.
    io_aliases = {3: 0} if donate_x else {}

    out2d = pl.pallas_call(
        _randcrop_kernel,
        out_shape=jax.ShapeDtypeStruct((R, L), x.dtype),
        grid_spec=grid_spec,
        input_output_aliases=io_aliases,
        compiler_params=pltpu.CompilerParams(
            dimension_semantics=("parallel", "parallel"),
            vmem_limit_bytes=int(vmem_limit)),
    )(keep, om_col, start_col, x2d)

    return out2d.reshape(B, C, L)


# ----------------------------------------------------------------------------
# Demo / smoke test
# ----------------------------------------------------------------------------
if __name__ == "__main__":
    # deterministic parameter init, mirroring RandCrop.__init__
    def logit(p):
        return math.log(p) - math.log1p(-p)

    initial_probability = [0.9999999, 0.9999999]
    probability_logits = jnp.array([logit(p) for p in initial_probability],
                                   dtype=jnp.float32)   # learned param (2,)
    magnitude = jnp.array([0.05], dtype=jnp.float32)     # fixed buffer (1,)

    # small deterministic inputs: B=2, C=4, L=128 (lane-friendly)
    key = jax.random.PRNGKey(0)
    kx, kl, kfwd = jax.random.split(key, 3)
    B, C, L = 2, 4, 128
    x = jax.random.normal(kx, (B, C, L), dtype=jnp.float32)
    label = jax.random.randint(kl, (B,), 0, 2, dtype=jnp.int32)

    fwd = jax.jit(functools.partial(rand_crop_forward,
                                    temperature=0.1, training=True))
    out = fwd(x, label, probability_logits, magnitude, kfwd)
    jax.block_until_ready(out)
    assert out.shape == (B, C, L) and out.dtype == x.dtype
    assert bool(jnp.all(jnp.isfinite(out)))
    print("KERNEL_OK")
</pallas_src>

<mosaic_0001>
module attributes {stable_mosaic.version = 11 : i64} {
  func.func @_randcrop_kernel(%arg0: i32, %arg1: i32, %arg2: memref<1xi32, #tpu.memory_space<smem>>, %arg3: memref<8x1xf32, #tpu.memory_space<vmem>>, %arg4: memref<8x1xi32, #tpu.memory_space<vmem>>, %arg5: memref<8x128xf32, #tpu.memory_space<vmem>>, %arg6: memref<8x128xf32, #tpu.memory_space<vmem>>) attributes {dimension_semantics = [#tpu.dimension_semantics<parallel>, #tpu.dimension_semantics<parallel>], iteration_bounds = array<i64: 1, 1>, scalar_prefetch = 1 : i64, scratch_operands = 0 : i64, tpu.core_type = #tpu.core_type<tc>, window_params = [{transform_indices = @transform_0, window_bounds = array<i64: 8, 1>}, {transform_indices = @transform_1, window_bounds = array<i64: 8, 1>}, {transform_indices = @transform_2, window_bounds = array<i64: 8, 128>}, {transform_indices = @transform_3, window_bounds = array<i64: 8, 128>}]} {
    %c128_i32 = arith.constant 128 : i32
    %0 = arith.muli %arg1, %c128_i32 : i32
    %c0 = arith.constant 0 : index
    %c0_0 = arith.constant 0 : index
    %1 = vector.load %arg5[%c0, %c0_0] : memref<8x128xf32, #tpu.memory_space<vmem>>, vector<8x128xf32>
    %c0_1 = arith.constant 0 : index
    %2 = memref.load %arg2[%c0_1] : memref<1xi32, #tpu.memory_space<smem>>
    %3 = tpu.iota {dimensions = array<i32: 1>} : vector<1x128xi32>
    %4 = vector.broadcast %0 : i32 to vector<1x128xi32>
    %5 = arith.addi %3, %4 : vector<1x128xi32>
    %c0_2 = arith.constant 0 : index
    %c0_3 = arith.constant 0 : index
    %6 = vector.load %arg4[%c0_2, %c0_3] : memref<8x1xi32, #tpu.memory_space<vmem>>, vector<8x1xi32>
    %7 = vector.broadcast %5 : vector<1x128xi32> to vector<8x128xi32>
    %8 = vector.broadcast %6 : vector<8x1xi32> to vector<8x128xi32>
    %9 = arith.subi %7, %8 : vector<8x128xi32>
    %10 = tpu.bitcast %9 : vector<8x128xi32> -> vector<8x128xi32>
    %11 = vector.broadcast %2 : i32 to vector<8x128xi32>
    %12 = arith.cmpi ult, %10, %11 : vector<8x128xi32>
    %c0_4 = arith.constant 0 : index
    %c0_5 = arith.constant 0 : index
    %13 = vector.load %arg3[%c0_4, %c0_5] : memref<8x1xf32, #tpu.memory_space<vmem>>, vector<8x1xf32>
    %cst = arith.constant 1.000000e+00 : f32
    %14 = vector.broadcast %cst : f32 to vector<8x128xf32>
    %15 = vector.shape_cast %13 : vector<8x1xf32> to vector<8x1xf32>
    %16 = vector.broadcast %15 : vector<8x1xf32> to vector<8x128xf32>
    %17 = arith.select %12, %14, %16 : vector<8x128xi1>, vector<8x128xf32>
    %18 = arith.mulf %1, %17 : vector<8x128xf32>
    %c0_6 = arith.constant 0 : index
    %c0_7 = arith.constant 0 : index
    %19 = vector.load %arg6[%c0_6, %c0_7] : memref<8x128xf32, #tpu.memory_space<vmem>>, vector<8x128xf32>
    tpu.vector_store %arg6[%c0_6, %c0_7], %18 {strides = array<i32>} : memref<8x128xf32, #tpu.memory_space<vmem>>, vector<8x128xf32>,
    return
  }
  func.func @transform_0(%arg0: i32, %arg1: i32, %arg2: memref<1xi32, #tpu.memory_space<smem>>) -> (i32, i32) {
    %c0_i32 = arith.constant 0 : i32
    %c0_i32_0 = arith.constant 0 : i32
    return %arg0, %c0_i32 : i32, i32
  }
  func.func @transform_1(%arg0: i32, %arg1: i32, %arg2: memref<1xi32, #tpu.memory_space<smem>>) -> (i32, i32) {
    %c0_i32 = arith.constant 0 : i32
    %c0_i32_0 = arith.constant 0 : i32
    return %arg0, %c0_i32 : i32, i32
  }
  func.func @transform_2(%arg0: i32, %arg1: i32, %arg2: memref<1xi32, #tpu.memory_space<smem>>) -> (i32, i32) {
    %c0_i32 = arith.constant 0 : i32
    return %arg0, %arg1 : i32, i32
  }
  func.func @transform_3(%arg0: i32, %arg1: i32, %arg2: memref<1xi32, #tpu.memory_space<smem>>) -> (i32, i32) {
    %c0_i32 = arith.constant 0 : i32
    return %arg0, %arg1 : i32, i32
  }
}

</mosaic_0001>

<bundles_post_ra>
// kernel: rand_crop_forward.1
= control target key start
LH: loop header
LB: loop body
LE: loop exit
PB: predicated region body
PF: predicated region fallthrough
CT: control target
= control target key end

     0   :  { %s131_s0 = inlined_call_operand.<no memory space> [shape: s32[1], index: 0, kind: input, shape index: {}]   ;;  %s132_s1 = inlined_call_operand.vmem [shape: f32[8,1], index: 1, kind: input, shape index: {}]   ;;  %s133_s2 = inlined_call_operand.vmem [shape: s32[8,1], index: 2, kind: input, shape index: {}]   ;;  %s134_s3 = inlined_call_operand.vmem [shape: f32[8,128], index: 3, kind: input, shape index: {}]   ;;  %s135_s4 = inlined_call_operand.hbm [shape: f32[8,128], index: 4, kind: output, shape index: {}]  }
   0x1   :  { %v24_v0 = vld [vmem:[%s133_s2] sm:$0xff] }
   0x2   :  { %10 = vsyncpa [#allocation5], 0  ;;  %v89_v1 = vmov 0   ;;  %v33_v2 = vld [vmem:[%s132_s1] sm:$0xff]  ;;  %v20_v3 = vlaneseq  ;;  %v29_v7 = vstv %s131_s0  ;;  %s90_s22 = smov [#allocation4]   ;;  %s49_s1 = sshll.u32 %s135_s4, 4  ;;  %s50_s1 = int_to_ptr.hbm [resolvable:$true] %s49_s1 }
   0x3   :  { %62 = vset.pattern.permute.xlu0 %v89_v1  ;;  %v59_v9 = vxor.u32 2147483648, %v29_v7  ;;  %v18_v10 = vld [vmem:[%s134_s3] sm:$0xff]  ;;  %s47_s23 = sshll.u32 %s90_s22, 4  ;;  %s48_s23 = int_to_ptr.vmem [resolvable:$true] %s47_s23 }
   0x4   :  { %26 = vperm.xlu0 %62, %v24_v0   ;;  %v21_v4 = vand.u32 127, %v20_v3 }
   0xc   :  { %36 = vperm.xlu0 %62, %v33_v2  }
  0x76   :  { %v27_v5 = vpop.permute.xlu0 %26 }
  0x77   :  { %v28_v6 = vsub.s32 %v21_v4, %v27_v5 }
  0x79   :  { %v58_v8 = vxor.u32 2147483648, %v28_v6 }
  0x7b   :  { %vm32_vm0 = vcmp.lt.s32.totalorder %v58_v8, %v59_v9 }
  0x7e   :  { %v37_v11 = vpop.permute.xlu0 %36 }
  0x7f   :  { %v39_v12 = vsel %vm32_vm0, 1.0, %v37_v11 }
  0x80   :  { %v40_v13 = vmul.f32 %v39_v12, %v18_v10 }
  0x82   :  { %41 = vst [vmem:[#allocation4] sm:$0xff] %v40_v13 }
  0x83   :  { %52 = dma.vmem_to_hbm [thread:$0]  %s48_s23, 128, %s50_s1, [#allocation5]  }
  0x84   :  { %87 = dma.done.wait [#allocation5], 128  }
  0x85   :  { %88 = vsyncadd [#allocation5], 4294967168 }
  0x86   :  { %57 = vsyncpa [#allocation5], 1 }

</bundles_post_ra>
